<compile_context>
chip_gen: v5e
topology: v5e:2x2
jax: 0.10.0
libtpu: 0.0.40
codegen_flags: <defaults>
</compile_context>

<pallas_src>
import functools

import jax
import jax.numpy as jnp
from jax.experimental import pallas as pl
from jax.experimental.pallas import tpu as pltpu


def _cdiv(a, b):
    return -(-a // b)


def _round_up(x, m):
    return _cdiv(x, m) * m


def _choose_pack(kernel_size, stride, channel, max_n=1024, max_w_row=512):
    """Pick G (frames packed per row) so W_row=(G-1)*S+K is a multiple of 128."""
    K, S, C = kernel_size, stride, channel
    g_min = max(1, _cdiv(K - S, S)) if K > S else 1   # halo must fit in one row shift
    g = g_min
    while True:
        w_row = (g - 1) * S + K
        if w_row > max_w_row or g * C > max_n:
            break
        if w_row % 128 == 0:
            return g                                   # lane-dense LHS
        g += 1
    # Fallback: aim for a >=256-lane output row; halo constraint still holds.
    g = max(g_min, min(max(1, 256 // C), max(1, (max_w_row - K) // S + 1)))
    while g > g_min and g * C > max_n:
        g -= 1
    return max(g, g_min)


def _conv_encoder_kernel(xe_ref, w_ref, out_ref):
    # xe_ref : [tm, W_row]   packed waveform rows (bf16), G*S samples + halo
    # w_ref  : [W_row, N_pad] banded conv weight (bf16, constant index_map -> resident)
    # out_ref: [tm, N_pad]   G frames x C channels per row + zero pad columns (f32)
    acc = jnp.dot(xe_ref[...], w_ref[...], preferred_element_type=jnp.float32)
    out_ref[...] = jnp.maximum(acc, 0.0).astype(out_ref.dtype)


@functools.partial(
    jax.jit, static_argnames=("kernel_size", "stride", "tm", "compute_dtype"))
def conv_encoder_forward(x, ilens, weight, *, kernel_size, stride,
                         tm=2048, compute_dtype=jnp.bfloat16):
    """ConvEncoder.forward.

    Args:
      x:      [B, T] float32 waveform.
      ilens:  [B] int32 lengths.
      weight: [C, 1, K] Conv1d weight (PyTorch layout, bias=False).
    Returns:
      feature: [B, F, C] (x.dtype), flens: [B] int32.
    """
    assert x.ndim == 2, "Currently only support single channel input"
    B, T = x.shape
    C = weight.shape[0]
    K, S = kernel_size, stride
    assert T >= K, "input must contain at least one full kernel window"
    F = (T - K) // S + 1                       # number of frames

    # ---- packing factor G (frames per packed row) ---------------------------
    G = _choose_pack(K, S, C)
    GS = G * S
    W_row = (G - 1) * S + K                    # samples consumed by one row
    halo = W_row - GS                          # = K - S (can be <= 0)
    N = G * C                                  # useful output lanes per row
    N_pad = _round_up(N, 128)                  # lane-dense (unmasked) stores

    in_bytes = jnp.dtype(compute_dtype).itemsize
    out_bytes = jnp.dtype(x.dtype).itemsize

    # ---- row tiling (VMEM-aware, multi-step so both v7x TCs get work) -------
    Np = _cdiv(F, G)                           # packed rows holding real frames
    vmem_budget = 24 << 20                     # double-buffered tiles budget
    per_row = 2 * (W_row * in_bytes + N_pad * out_bytes)
    tm_vmem = max(8, ((vmem_budget - W_row * N_pad * in_bytes) // per_row) // 8 * 8)
    tm_cap = max(8, min(tm, tm_vmem, _round_up(Np, 8)))
    nchunk = _cdiv(Np, tm_cap)
    if B * Np >= 32:                           # ensure >=4 total grid steps
        nchunk = max(nchunk, _cdiv(4, B))
    elif B * Np >= 8:                          # ensure >=2 total grid steps
        nchunk = max(nchunk, _cdiv(2, B))
    tm_eff = _round_up(_cdiv(Np, nchunk), 8)   # rebalance -> minimal padding
    nchunk = _cdiv(Np, tm_eff)
    Np_pad = nchunk * tm_eff
    rows = B * Np_pad

    # ---- packed waveform rows (slice + reshape + concat + bf16 cast only) ---
    # TODO(synk): this packing is still one extra fused HBM pass over the
    # waveform; eliminating it needs overlapping-window DMA inside the kernel.
    T_pad = max(T, Np_pad * GS + (GS if halo > 0 else 0))
    x_pad = jnp.pad(x, ((0, 0), (0, T_pad - T))) if T_pad > T else x
    x_c = x_pad.astype(compute_dtype)
    base = x_c[:, : Np_pad * GS].reshape(B, Np_pad, GS)
    if halo > 0:
        shifted = x_c[:, GS : GS + Np_pad * GS].reshape(B, Np_pad, GS)
        xe = jnp.concatenate([base, shifted[:, :, :halo]], axis=2)
    elif halo < 0:
        xe = base[:, :, :W_row]
    else:
        xe = base
    xe = xe.reshape(rows, W_row)

    # ---- banded weight: folds the im2col into the matmul --------------------
    # w_full[j*S + k, j*C + c] = weight[c, 0, k]  for j in [0, G), k in [0, K);
    # columns N..N_pad-1 stay zero (lane padding, stripped after the kernel).
    w2d = jnp.transpose(weight[:, 0, :], (1, 0)).astype(compute_dtype)   # [K, C]
    w_full = jnp.zeros((W_row, N_pad), dtype=compute_dtype)
    for j in range(G):
        w_full = w_full.at[j * S : j * S + K, j * C : (j + 1) * C].set(w2d)

    grid = (rows // tm_eff,)                   # exact by construction
    vmem_need = per_row * tm_eff + W_row * N_pad * in_bytes
    vmem_limit = int(min(max(vmem_need + (8 << 20), 32 << 20), 56 << 20))

    cost = pl.CostEstimate(
        flops=2 * rows * W_row * N_pad,
        transcendentals=0,
        bytes_accessed=(rows * W_row * in_bytes
                        + W_row * N_pad * in_bytes
                        + rows * N_pad * out_bytes),
    )

    out = pl.pallas_call(
        _conv_encoder_kernel,
        out_shape=jax.ShapeDtypeStruct((rows, N_pad), x.dtype),
        grid_spec=pltpu.PrefetchScalarGridSpec(
            num_scalar_prefetch=0,
            grid=grid,
            in_specs=[
                pl.BlockSpec((tm_eff, W_row), lambda i: (i, 0)),   # waveform rows
                pl.BlockSpec((W_row, N_pad), lambda i: (0, 0)),    # resident weight
            ],
            out_specs=pl.BlockSpec((tm_eff, N_pad), lambda i: (i, 0)),
        ),
        compiler_params=pltpu.CompilerParams(
            dimension_semantics=("parallel",),
            vmem_limit_bytes=vmem_limit,
        ),
        cost_estimate=cost,
    )(xe, w_full)

    # Unpack: row r, lane-group j -> frame r*G + j; strip pad columns & frames.
    feature = out[:, :N].reshape(B, Np_pad * G, C)[:, :F, :]       # [B, F, C]
    flens = (ilens - K) // S + 1
    return feature, flens


if __name__ == "__main__":
    # Small, deterministic example consistent with the module.
    B = 2
    channel = 32        # C (output_dim)
    kernel_size = 16    # K
    stride = 8          # S
    T = 136             # samples  -> F = (136 - 16)//8 + 1 = 16

    key = jax.random.PRNGKey(0)
    kx, kw = jax.random.split(key)
    x = jax.random.normal(kx, (B, T), dtype=jnp.float32)
    ilens = jnp.array([T, T - stride], dtype=jnp.int32)
    # Deterministic synthetic conv weight, PyTorch Conv1d layout [C, 1, K].
    weight = jax.random.normal(kw, (channel, 1, kernel_size), dtype=jnp.float32) * 0.1

    feature, flens = conv_encoder_forward(
        x, ilens, weight, kernel_size=kernel_size, stride=stride)
    feature = jax.block_until_ready(feature)
    flens = jax.block_until_ready(flens)

    # References. The kernel multiplies bf16-cast operands with f32
    # accumulation, so compare tightly against a reference built from the same
    # bf16-cast inputs, and loosely against the pure-f32 math.
    F = (T - kernel_size) // stride + 1
    tap_idx = jnp.arange(F)[:, None] * stride + jnp.arange(kernel_size)[None, :]
    x_q = x.astype(jnp.bfloat16).astype(jnp.float32)
    w_q = weight.astype(jnp.bfloat16).astype(jnp.float32)
    ref_bf16 = jnp.maximum(
        jnp.einsum("bfk,ck->bfc", x_q[:, tap_idx], w_q[:, 0, :],
                   precision=jax.lax.Precision.HIGHEST), 0.0)
    ref_f32 = jnp.maximum(
        jnp.einsum("bfk,ck->bfc", x[:, tap_idx], weight[:, 0, :],
                   precision=jax.lax.Precision.HIGHEST), 0.0)

    assert feature.shape == (B, F, channel), feature.shape
    assert jnp.allclose(feature, ref_bf16, atol=2e-3, rtol=2e-3)
    assert jnp.allclose(feature, ref_f32, atol=3e-2, rtol=3e-2)
    assert jnp.array_equal(flens, (ilens - kernel_size) // stride + 1)

    print("KERNEL_OK")
</pallas_src>

<mosaic_0001>
module attributes {stable_mosaic.version = 11 : i64} {
  func.func @_conv_encoder_kernel(%arg0: i32, %arg1: memref<8x128xbf16, #tpu.memory_space<vmem>>, %arg2: memref<128x512xbf16, #tpu.memory_space<vmem>>, %arg3: memref<8x512xf32, #tpu.memory_space<vmem>>) attributes {dimension_semantics = [#tpu.dimension_semantics<parallel>], iteration_bounds = array<i64: 2>, scalar_prefetch = 0 : i64, scratch_operands = 0 : i64, tpu.core_type = #tpu.core_type<tc>, window_params = [{transform_indices = @transform_0, window_bounds = array<i64: 8, 128>}, {pipeline_mode = #tpu.pipeline_mode<synchronous>, transform_indices = @transform_1, window_bounds = array<i64: 128, 512>}, {transform_indices = @transform_2, window_bounds = array<i64: 8, 512>}]} {
    %c0 = arith.constant 0 : index
    %c0_0 = arith.constant 0 : index
    %0 = vector.load %arg1[%c0, %c0_0] : memref<8x128xbf16, #tpu.memory_space<vmem>>, vector<8x128xbf16>
    %c0_1 = arith.constant 0 : index
    %c0_2 = arith.constant 0 : index
    %1 = vector.load %arg2[%c0_1, %c0_2] : memref<128x512xbf16, #tpu.memory_space<vmem>>, vector<128x512xbf16>
    %cst = arith.constant dense<0.000000e+00> : vector<8x512xf32>
    %2 = tpu.matmul %0, %1, %cst {dimension_numbers = #tpu.dot_dimension_numbers<[1], [0], [0], [1], [0, 0, 1, 1], [], []>} : vector<8x128xbf16>, vector<128x512xbf16>, vector<8x512xf32> -> vector<8x512xf32>
    %cst_3 = arith.constant 0.000000e+00 : f32
    %3 = vector.broadcast %cst_3 : f32 to vector<8x512xf32>
    %4 = arith.maximumf %2, %3 : vector<8x512xf32>
    %c0_4 = arith.constant 0 : index
    %c0_5 = arith.constant 0 : index
    %5 = vector.load %arg3[%c0_4, %c0_5] : memref<8x512xf32, #tpu.memory_space<vmem>>, vector<8x512xf32>
    tpu.vector_store %arg3[%c0_4, %c0_5], %4 {strides = array<i32>} : memref<8x512xf32, #tpu.memory_space<vmem>>, vector<8x512xf32>,
    return
  }
  func.func @transform_0(%arg0: i32) -> (i32, i32) {
    %c0_i32 = arith.constant 0 : i32
    %c0_i32_0 = arith.constant 0 : i32
    return %arg0, %c0_i32 : i32, i32
  }
  func.func @transform_1(%arg0: i32) -> (i32, i32) {
    %c0_i32 = arith.constant 0 : i32
    %c0_i32_0 = arith.constant 0 : i32
    %c0_i32_1 = arith.constant 0 : i32
    return %c0_i32, %c0_i32_0 : i32, i32
  }
  func.func @transform_2(%arg0: i32) -> (i32, i32) {
    %c0_i32 = arith.constant 0 : i32
    %c0_i32_0 = arith.constant 0 : i32
    return %arg0, %c0_i32 : i32, i32
  }
}

</mosaic_0001>

<bundles_post_ra>
// kernel: conv_encoder_forward.1
= control target key start
LH: loop header
LB: loop body
LE: loop exit
PB: predicated region body
PF: predicated region fallthrough
CT: control target
= control target key end

     0   :  { %s651_s9 = smov 0   ;;  %s868_s0 = inlined_call_operand.vmem [shape: bf16[16,128], index: 0, kind: input, shape index: {}]   ;;  %s869_s1 = inlined_call_operand.vmem [shape: bf16[128,512], index: 1, kind: input, shape index: {}]   ;;  %s870_s2 = inlined_call_operand.vmem [shape: f32[16,512], index: 2, kind: output, shape index: {}]  }
   0x1 LB: > { %s449_s10 = sadd.s32 4294967295, %s634_s9   ;;  %p453_p0 = scmp.ge.s32.totalorder %s634_s9, 1  ;;  %s634_s9 = sphi %s651_s9, %s12_s9  }
   0x2   : > { %p111_p1 = scmp.lt.s32.totalorder %s634_s9, 3 }
   0x4   : > { %p112_p2 = pnand %p453_p0, %p111_p1 }
   0x5   : > { %p132_p3 = scmp.lt.s32.totalorder (!%p112_p2), %s449_s10, 1 }
   0x6   : > { %115 = sbr.rel (%p112_p2) target bundleno = 187 (0xbb), region = 28 }
   0xb   : > { %v571_v0 = vld [vmem:[%s869_s1 + $0xe0] sm:$0xf]  ;;  %v618_v1 = vld [vmem:[%s869_s1 + $0xec] sm:$0xf0]  ;;  %v616_v2 = vld [vmem:[%s869_s1 + $0xe4] sm:$0xf] }
   0xc   : > { %v572_v3 = vor.u32 %v618_v1, %v571_v0  ;;  %v573_v4 = vld [vmem:[%s869_s1 + $0xf0] sm:$0xf0]  ;;  %v579_v5 = vld [vmem:[%s869_s1 + $0xe8] sm:$0xf]  ;;  %v619_v6 = vld [vmem:[%s869_s1 + $0xf4] sm:$0xf0] }
   0xd   : > { %v576_v7 = vor.u32 %v616_v2, %v573_v4  ;;  %v580_v8 = vor.u32 %v619_v6, %v579_v5  ;;  %v617_v9 = vld [vmem:[%s869_s1 + $0xec] sm:$0xf]  ;;  %v581_v10 = vld [vmem:[%s869_s1 + $0xf8] sm:$0xf0]  ;;  %v555_v11 = vld [vmem:[%s869_s1 + $0xc0] sm:$0xf] }
   0xe   : > { %334 = vmatpush.bf16.msra.mxu0 %v572_v3  ;;  %v584_v12 = vor.u32 %v617_v9, %v581_v10  ;;  %v614_v13 = vld [vmem:[%s869_s1 + $0xcc] sm:$0xf0]  ;;  %v612_v14 = vld [vmem:[%s869_s1 + $0xc4] sm:$0xf]  ;;  %v557_v15 = vld [vmem:[%s869_s1 + $0xd0] sm:$0xf0] }
   0xf   : > { %347 = vmatpush.bf16.msra.mxu1 %v576_v7  ;;  %360 = vmatpush.bf16.msra.mxu2 %v580_v8  ;;  %v556_v16 = vor.u32 %v614_v13, %v555_v11  ;;  %v560_v17 = vor.u32 %v612_v14, %v557_v15  ;;  %v563_v18 = vld [vmem:[%s869_s1 + $0xc8] sm:$0xf]  ;;  %v615_v19 = vld [vmem:[%s869_s1 + $0xd4] sm:$0xf0]  ;;  %v613_v20 = vld [vmem:[%s869_s1 + $0xcc] sm:$0xf] }
  0x10   : > { %373 = vmatpush.bf16.msra.mxu3 %v584_v12  ;;  %v564_v21 = vor.u32 %v615_v19, %v563_v18  ;;  %v565_v22 = vld [vmem:[%s869_s1 + $0xd8] sm:$0xf0]  ;;  %v539_v23 = vld [vmem:[%s869_s1 + $0xa0] sm:$0xf]  ;;  %v610_v24 = vld [vmem:[%s869_s1 + $0xac] sm:$0xf0] }
  0x11   : > { %v568_v25 = vor.u32 %v613_v20, %v565_v22  ;;  %v608_v26 = vld [vmem:[%s869_s1 + $0xa4] sm:$0xf]  ;;  %v541_v27 = vld [vmem:[%s869_s1 + $0xb0] sm:$0xf0]  ;;  %v547_v28 = vld [vmem:[%s869_s1 + $0xa8] sm:$0xf]  ;;  %v540_v29 = vor.u32 %v610_v24, %v539_v23 }
  0x12   : > { %335 = vmatpush.bf16.msra.mxu0 %v556_v16  ;;  %v611_v30 = vld [vmem:[%s869_s1 + $0xb4] sm:$0xf0]  ;;  %v609_v31 = vld [vmem:[%s869_s1 + $0xac] sm:$0xf]  ;;  %v549_v32 = vld [vmem:[%s869_s1 + $0xb8] sm:$0xf0]  ;;  %v544_v33 = vor.u32 %v608_v26, %v541_v27 }
  0x13   : > { %348 = vmatpush.bf16.msra.mxu1 %v560_v17  ;;  %361 = vmatpush.bf16.msra.mxu2 %v564_v21  ;;  %v548_v34 = vor.u32 %v611_v30, %v547_v28  ;;  %v523_v35 = vld [vmem:[%s869_s1 + $0x80] sm:$0xf]  ;;  %v606_v36 = vld [vmem:[%s869_s1 + $0x8c] sm:$0xf0]  ;;  %v604_v37 = vld [vmem:[%s869_s1 + $0x84] sm:$0xf]  ;;  %v552_v38 = vor.u32 %v609_v31, %v549_v32 }
  0x14   : > { %374 = vmatpush.bf16.msra.mxu3 %v568_v25  ;;  %v525_v39 = vld [vmem:[%s869_s1 + $0x90] sm:$0xf0]  ;;  %v531_v40 = vld [vmem:[%s869_s1 + $0x88] sm:$0xf]  ;;  %v607_v41 = vld [vmem:[%s869_s1 + $0x94] sm:$0xf0]  ;;  %v524_v44 = vor.u32 %v606_v36, %v523_v35 }
  0x15   : > { %v605_v42 = vld [vmem:[%s869_s1 + $0x8c] sm:$0xf]  ;;  %v533_v43 = vld [vmem:[%s869_s1 + $0x98] sm:$0xf0]  ;;  %v528_v45 = vor.u32 %v604_v37, %v525_v39  ;;  %v532_v46 = vor.u32 %v607_v41, %v531_v40  ;;  %v507_v47 = vld [vmem:[%s869_s1 + $0x60] sm:$0xf] }
  0x16   : > { %336 = vmatpush.bf16.msra.mxu0 %v540_v29  ;;  %v602_v48 = vld [vmem:[%s869_s1 + $0x6c] sm:$0xf0]  ;;  %v600_v49 = vld [vmem:[%s869_s1 + $0x64] sm:$0xf]  ;;  %v536_v50 = vor.u32 %v605_v42, %v533_v43  ;;  %v509_v51 = vld [vmem:[%s869_s1 + $0x70] sm:$0xf0] }
  0x17   : > { %349 = vmatpush.bf16.msra.mxu1 %v544_v33  ;;  %362 = vmatpush.bf16.msra.mxu2 %v548_v34  ;;  %v515_v52 = vld [vmem:[%s869_s1 + $0x68] sm:$0xf]  ;;  %v603_v53 = vld [vmem:[%s869_s1 + $0x74] sm:$0xf0]  ;;  %v601_v54 = vld [vmem:[%s869_s1 + $0x6c] sm:$0xf]  ;;  %v508_v56 = vor.u32 %v602_v48, %v507_v47  ;;  %v512_v57 = vor.u32 %v600_v49, %v509_v51 }
  0x18   : > { %375 = vmatpush.bf16.msra.mxu3 %v552_v38  ;;  %v517_v55 = vld [vmem:[%s869_s1 + $0x78] sm:$0xf0]  ;;  %v516_v58 = vor.u32 %v603_v53, %v515_v52  ;;  %v491_v59 = vld [vmem:[%s869_s1 + $0x40] sm:$0xf]  ;;  %v598_v60 = vld [vmem:[%s869_s1 + $0x4c] sm:$0xf0] }
  0x19   : > { %v596_v61 = vld [vmem:[%s869_s1 + $0x44] sm:$0xf]  ;;  %v520_v62 = vor.u32 %v601_v54, %v517_v55  ;;  %v493_v63 = vld [vmem:[%s869_s1 + $0x50] sm:$0xf0]  ;;  %v499_v0 = vld [vmem:[%s869_s1 + $0x48] sm:$0xf]  ;;  %v492_v4 = vor.u32 %v598_v60, %v491_v59 }
  0x1a   : > { %337 = vmatpush.bf16.msra.mxu0 %v524_v44  ;;  %v599_v1 = vld [vmem:[%s869_s1 + $0x54] sm:$0xf0]  ;;  %v597_v2 = vld [vmem:[%s869_s1 + $0x4c] sm:$0xf]  ;;  %v501_v3 = vld [vmem:[%s869_s1 + $0x58] sm:$0xf0]  ;;  %v496_v6 = vor.u32 %v596_v61, %v493_v63 }
  0x1b   : > { %350 = vmatpush.bf16.msra.mxu1 %v528_v45  ;;  %363 = vmatpush.bf16.msra.mxu2 %v532_v46  ;;  %v475_v5 = vld [vmem:[%s869_s1 + $0x20] sm:$0xf]  ;;  %v500_v7 = vor.u32 %v599_v1, %v499_v0  ;;  %v594_v8 = vld [vmem:[%s869_s1 + $0x2c] sm:$0xf0]  ;;  %v592_v9 = vld [vmem:[%s869_s1 + $0x24] sm:$0xf]  ;;  %v504_v11 = vor.u32 %v597_v2, %v501_v3 }
  0x1c   : > { %376 = vmatpush.bf16.msra.mxu3 %v536_v50  ;;  %v477_v10 = vld [vmem:[%s869_s1 + $0x30] sm:$0xf0]  ;;  %v483_v12 = vld [vmem:[%s869_s1 + $0x28] sm:$0xf]  ;;  %v595_v13 = vld [vmem:[%s869_s1 + $0x34] sm:$0xf0]  ;;  %v476_v16 = vor.u32 %v594_v8, %v475_v5 }
  0x1d   : > { %v593_v14 = vld [vmem:[%s869_s1 + $0x2c] sm:$0xf]  ;;  %v485_v15 = vld [vmem:[%s869_s1 + $0x38] sm:$0xf0]  ;;  %v459_v17 = vld [vmem:[%s869_s1] sm:$0xf]  ;;  %v480_v18 = vor.u32 %v592_v9, %v477_v10  ;;  %v484_v19 = vor.u32 %v595_v13, %v483_v12 }
  0x1e   : > { %338 = vmatpush.bf16.msra.mxu0 %v508_v56  ;;  %s872_s10 = smov (!%p132_p3, %s449_s10), 1  ;;  %v590_v20 = vld [vmem:[%s869_s1 + $0xc] sm:$0xf0]  ;;  %v588_v21 = vld [vmem:[%s869_s1 + $0x4] sm:$0xf]  ;;  %v488_v23 = vor.u32 %v593_v14, %v485_v15 }
  0x1f   : > { %351 = vmatpush.bf16.msra.mxu1 %v512_v57  ;;  %364 = vmatpush.bf16.msra.mxu2 %v516_v58  ;;  %v461_v22 = vld [vmem:[%s869_s1 + $0x10] sm:$0xf0]  ;;  %v467_v24 = vld [vmem:[%s869_s1 + $0x8] sm:$0xf]  ;;  %v591_v25 = vld [vmem:[%s869_s1 + $0x14] sm:$0xf0]  ;;  %v460_v28 = vor.u32 %v590_v20, %v459_v17 }
  0x20   : > { %377 = vmatpush.bf16.msra.mxu3 %v520_v62  ;;  %s454_s3 = sshll.u32 %s872_s10, 2  ;;  %v589_v26 = vld [vmem:[%s869_s1 + $0xc] sm:$0xf]  ;;  %v469_v27 = vld [vmem:[%s869_s1 + $0x18] sm:$0xf0]  ;;  %v464_v29 = vor.u32 %v588_v21, %v461_v22  ;;  %v468_v30 = vor.u32 %v591_v25, %v467_v24  ;;  %s587_s13 = sshll.u32 %s872_s10, 5 }
  0x21   : > { %s135_s12 = scalar_lea.vmem %s868_s0, %s454_s3  ;;  %v472_v31 = vor.u32 %v589_v26, %v469_v27  ;;  %s140_s16 = scalar_lea.vmem %s870_s2, %s587_s13 }
  0x22   : > { %339 = vmatpush.bf16.msra.mxu0 %v492_v4  ;;  %v141_v32 = vld [vmem:[%s135_s12] sm:$0xf] }
  0x23   : > { %352 = vmatpush.bf16.msra.mxu1 %v496_v6  ;;  %365 = vmatpush.bf16.msra.mxu2 %v500_v7 }
  0x24   : > { %378 = vmatpush.bf16.msra.mxu3 %v504_v11 }
  0x26   : > { %340 = vmatpush.bf16.msra.mxu0 %v476_v16 }
  0x27   : > { %353 = vmatpush.bf16.msra.mxu1 %v480_v18  ;;  %366 = vmatpush.bf16.msra.mxu2 %v484_v19 }
  0x28   : > { %379 = vmatpush.bf16.msra.mxu3 %v488_v23 }
  0x2a   : > { %341 = vmatpush.bf16.msra.mxu0 %v460_v28 }
  0x2b   : > { %354 = vmatpush.bf16.msra.mxu1 %v464_v29  ;;  %367 = vmatpush.bf16.msra.mxu2 %v468_v30 }
  0x2c   : > { %380 = vmatpush.bf16.msra.mxu3 %v472_v31 }
  0x2d   : > { %342 = vmatmul.bf16.vlgmr.msra.gmra.mxu0 %v141_v32 }
  0x2e   : > { %355 = vmatmul.bf16.vlgmr.msra.gmra.mxu1 %v141_v32  ;;  %368 = vmatmul.bf16.vlgmr.msra.gmra.mxu2 %v141_v32 }
  0x2f   : > { %381 = vmatmul.bf16.vlgmr.msra.gmra.mxu3 %v141_v32 }
  0xaa   : > { %v343_v33 = vpop.f32.mrf.mxu0 }
  0xab   : > { %v386_v34 = vmax.f32 %v343_v33, 0.0  ;;  %v356_v35 = vpop.f32.mrf.mxu1 }
  0xac   : > { %v387_v36 = vmax.f32 %v356_v35, 0.0 }
  0xad   : > { %390 = vst [vmem:[%s140_s16] sm:$0xff] %v386_v34 }
  0xae   : > { %391 = vst [vmem:[%s140_s16 + $0x8] sm:$0xff] %v387_v36 }
  0xb1   : > { %v369_v37 = vpop.f32.mrf.mxu2 }
  0xb2   : > { %v388_v38 = vmax.f32 %v369_v37, 0.0  ;;  %v382_v39 = vpop.f32.mrf.mxu3  ;;  %v345_v40 = vpop.f32.mrf.mxu0 }
  0xb3   : > { %v389_v41 = vmax.f32 %v382_v39, 0.0  ;;  %v358_v42 = vpop.f32.mrf.mxu1 }
  0xb4   : > { %392 = vst [vmem:[%s140_s16 + $0x10] sm:$0xff] %v388_v38 }
  0xb5   : > { %393 = vst [vmem:[%s140_s16 + $0x18] sm:$0xff] %v389_v41 }
  0xb9   : > { %v371_v43 = vpop.f32.mrf.mxu2 }
  0xba   : > { %v384_v44 = vpop.f32.mrf.mxu3 }
  0xbb PF: > { %s12_s9 = sadd.s32 1, %s634_s9  }
  0xbc   : > { %p9_p4 = scmp.ge.s32.totalorder %s12_s9, 4  }
  0xbe   :  { %11 = sbr.rel (!%p9_p4) target bundleno = 1 (0x1), region = 58 }

</bundles_post_ra>
